<compile_context>
chip_gen: v7x
topology: tpu7x:2x2x1
jax: 0.10.0
libtpu: 0.0.40
codegen_flags: <defaults>
</compile_context>

<pallas_src>
import math
import functools

import jax
import jax.numpy as jnp
from jax.experimental import pallas as pl
from jax.experimental.pallas import tpu as pltpu


def _rmsnorm_kernel(x_ref, w_ref, o_ref, *, eps):
    # x_ref: (tm, D) tile of rows; w_ref: (1, D) weight (resident across the grid).
    x = x_ref[...].astype(jnp.float32)
    w = w_ref[...].astype(jnp.float32)
    # torch.norm(x, dim=-1, keepdim=True) == L2 norm over the last axis.
    norm = jnp.sqrt(jnp.sum(x * x, axis=-1, keepdims=True))           # (tm, 1)
    # Reciprocal computed once per row on the (tm, 1) vector; approx variant runs on the
    # EUP slot (effectively free) and turns the per-element divide into a single multiply.
    inv = pl.reciprocal(norm + eps, approx=True)                      # (tm, 1)
    o_ref[...] = ((x * inv) * w).astype(o_ref.dtype)


def rmsnorm(x, weight, eps=1e-5, *, tm=None, vmem_limit_bytes=48 * 1024 * 1024):
    """out = weight * x / (||x||_2(last axis) + eps), matching the PyTorch module."""
    orig_shape = x.shape
    dim = orig_shape[-1]
    assert weight.shape == (dim,)

    rows = 1
    for s in orig_shape[:-1]:
        rows *= s
    rows = max(rows, 1)

    x2d = x.reshape(rows, dim)
    w2d = weight.reshape(1, dim)

    # Pick the row-tile size: target ~4 MiB per tile (measured sweet spot for mem-bound
    # elementwise kernels), counted at 4 B/elem since in-kernel temporaries are f32.
    # Keep tm a multiple of 16 (valid for f32 and bf16 sublane packing), cap at 1024, and
    # stay well inside a 48 MiB scoped-VMEM budget (safe on v5e/v6e/v7x) including the
    # double-buffered input + output tiles and f32 temporaries.
    if tm is None:
        target_tile_bytes = 4 * 1024 * 1024
        tm = (target_tile_bytes // (dim * 4)) // 16 * 16
        tm = max(16, min(tm, 1024))
    if rows <= tm:
        # Single block covering the full row extent — always a legal block shape.
        tm = rows

    # TODO(synk): for very narrow dims (< 128 lanes, e.g. dim=32 here) the stores are masked
    # partial vst; a lane-dense re-layout (folding rows into lanes) would give up to ~4x more
    # store bandwidth for such shapes. Typical LLM dims (2048-8192) are already lane-dense.

    grid = (pl.cdiv(rows, tm),)  # ragged last block handled by Pallas masking — no host pad.

    kernel = functools.partial(_rmsnorm_kernel, eps=eps)

    out2d = pl.pallas_call(
        kernel,
        out_shape=jax.ShapeDtypeStruct((rows, dim), x.dtype),
        grid_spec=pltpu.PrefetchScalarGridSpec(
            num_scalar_prefetch=0,
            grid=grid,
            in_specs=[
                pl.BlockSpec((tm, dim), lambda i: (i, 0)),
                pl.BlockSpec((1, dim), lambda i: (0, 0)),  # same block every step -> resident
            ],
            out_specs=pl.BlockSpec((tm, dim), lambda i: (i, 0)),
        ),
        compiler_params=pltpu.CompilerParams(
            dimension_semantics=("parallel",),       # row axis shards across TCs on v7x
            vmem_limit_bytes=vmem_limit_bytes,
        ),
    )(x2d, w2d)

    return out2d.reshape(orig_shape)


if __name__ == "__main__":
    key = jax.random.PRNGKey(0)
    batch, seq, hidden = 2, 8, 32
    kx, _ = jax.random.split(key)
    x = jax.random.normal(kx, (batch, seq, hidden), dtype=jnp.float32)

    # Deterministic parameter init: module uses torch.ones(dim).
    weight = jnp.ones((hidden,), dtype=jnp.float32)
    eps = 1e-5

    out = rmsnorm(x, weight, eps)
    out = jax.block_until_ready(out)

    # Reference check in plain JAX (same semantics as the PyTorch forward, exact divide).
    norm = jnp.sqrt(jnp.sum(x.astype(jnp.float32) ** 2, axis=-1, keepdims=True))
    ref = weight * x / (norm + eps)
    assert out.shape == x.shape
    # Tolerance loosened slightly vs exact divide because the kernel uses the EUP approx
    # reciprocal (relative error ~1e-4), still far tighter than bf16 precision.
    assert jnp.allclose(out, ref, atol=2e-3, rtol=2e-3), "mismatch vs reference"

    print("KERNEL_OK")
</pallas_src>

<mosaic_0001>
module attributes {stable_mosaic.version = 11 : i64} {
  func.func @_rmsnorm_kernel(%arg0: i32, %arg1: memref<16x32xf32, #tpu.memory_space<vmem>>, %arg2: memref<1x32xf32, #tpu.memory_space<vmem>>, %arg3: memref<16x32xf32, #tpu.memory_space<vmem>>) attributes {dimension_semantics = [#tpu.dimension_semantics<parallel>], iteration_bounds = array<i64: 1>, scalar_prefetch = 0 : i64, scratch_operands = 0 : i64, tpu.core_type = #tpu.core_type<tc>, window_params = [{transform_indices = @transform_0, window_bounds = array<i64: 16, 32>}, {pipeline_mode = #tpu.pipeline_mode<synchronous>, transform_indices = @transform_1, window_bounds = array<i64: 1, 32>}, {transform_indices = @transform_2, window_bounds = array<i64: 16, 32>}]} {
    %c0 = arith.constant 0 : index
    %c0_0 = arith.constant 0 : index
    %0 = vector.load %arg1[%c0, %c0_0] : memref<16x32xf32, #tpu.memory_space<vmem>>, vector<16x32xf32>
    %c0_1 = arith.constant 0 : index
    %c0_2 = arith.constant 0 : index
    %1 = vector.load %arg2[%c0_1, %c0_2] : memref<1x32xf32, #tpu.memory_space<vmem>>, vector<1x32xf32>
    %2 = arith.mulf %0, %0 : vector<16x32xf32>
    %cst = arith.constant dense<0.000000e+00> : vector<16xf32>
    %3 = vector.multi_reduction <add>, %2, %cst [1] : vector<16x32xf32> to vector<16xf32>
    %4 = vector.shape_cast %3 : vector<16xf32> to vector<16x1xf32>
    %5 = math.sqrt %4 : vector<16x1xf32>
    %cst_3 = arith.constant 9.99999974E-6 : f32
    %6 = vector.broadcast %cst_3 : f32 to vector<16x1xf32>
    %7 = arith.addf %5, %6 : vector<16x1xf32>
    %8 = tpu.reciprocal %7 {approx = true} : vector<16x1xf32> -> vector<16x1xf32>
    %9 = vector.broadcast %8 : vector<16x1xf32> to vector<16x32xf32>
    %10 = arith.mulf %0, %9 : vector<16x32xf32>
    %11 = vector.broadcast %1 : vector<1x32xf32> to vector<16x32xf32>
    %12 = arith.mulf %10, %11 : vector<16x32xf32>
    %c0_4 = arith.constant 0 : index
    %c0_5 = arith.constant 0 : index
    %13 = vector.load %arg3[%c0_4, %c0_5] : memref<16x32xf32, #tpu.memory_space<vmem>>, vector<16x32xf32>
    tpu.vector_store %arg3[%c0_4, %c0_5], %12 {strides = array<i32>} : memref<16x32xf32, #tpu.memory_space<vmem>>, vector<16x32xf32>,
    return
  }
  func.func @transform_0(%arg0: i32) -> (i32, i32) {
    %c0_i32 = arith.constant 0 : i32
    %c0_i32_0 = arith.constant 0 : i32
    return %arg0, %c0_i32 : i32, i32
  }
  func.func @transform_1(%arg0: i32) -> (i32, i32) {
    %c0_i32 = arith.constant 0 : i32
    %c0_i32_0 = arith.constant 0 : i32
    %c0_i32_1 = arith.constant 0 : i32
    return %c0_i32, %c0_i32_0 : i32, i32
  }
  func.func @transform_2(%arg0: i32) -> (i32, i32) {
    %c0_i32 = arith.constant 0 : i32
    %c0_i32_0 = arith.constant 0 : i32
    return %arg0, %c0_i32 : i32, i32
  }
}

</mosaic_0001>

<bundles_post_ra>
// kernel: tpu_custom_call.1
= control target key start
LH: loop header
LB: loop body
LE: loop exit
PB: predicated region body
PF: predicated region fallthrough
CT: control target
= control target key end

     0   :  { %7 = vsyncpa [#allocation3], 0  ;;  %s202_s0 = inlined_call_operand.hbm [shape: f32[16,32], index: 0, kind: input, shape index: {}]   ;;  %s203_s1 = inlined_call_operand.vmem [shape: f32[1,32], index: 1, kind: input, shape index: {}]   ;;  %s204_s2 = inlined_call_operand.hbm [shape: f32[16,32], index: 2, kind: output, shape index: {}]  }
   0x1   :  { %8 = vsyncpa [#allocation4], 0  ;;  %s146_s9 = smov [#allocation2]   ;;  %s98_s13 = scalar_lea.hbm %s202_s0, 256 }
   0x2   :  { %s14_s10 = sshll.u32 %s146_s9, 4  ;;  %p99_p0 = scmp.ne.s32.totalorder %s202_s0, %s98_s13  ;;  %s15_s10 = int_to_ptr.vmem [resolvable:$true] %s14_s10 }
   0x3   :  { %p102_p1 = scmp.lt.u32.totalorder %s98_s13, %s202_s0 }
   0x5   :  { %p104_p2 = pnand %p102_p1, %p99_p0 }
   0x7   :  { %107 = shalt.err (!%p104_p2)
}
   0x8   :  { %s108_s18 = scalar_lea.vmem %s15_s10, 256  ;;  %p113_p4 = scmp.lt.s32.totalorder %s15_s10, %s15_s10 }
   0x9   :  { %p109_p3 = scmp.ne.s32.totalorder %s15_s10, %s108_s18  ;;  %p114_p5 = scmp.lt.s32.totalorder %s108_s18, %s108_s18 }
   0xb   :  { %p115_p6 = por %p114_p5, %p113_p4 }
   0xd   :  { %p116_p7 = pnand %p115_p6, %p109_p3 }
   0xf   :  { %119 = shalt.err (!%p116_p7)
}
  0x10   :  { %s147_s19 = smov 128   ;;  %s148_s20 = smov 8  }
  0x11   :  { %20 = dma.hbm_to_vmem [thread:$0]  %s202_s0, 256, %s15_s10, [#allocation3], %s147_s19, %s147_s19, %s148_s20  }
  0x12   :  { %142 = dma.done.wait [#allocation3], 256  }
  0x13   :  { %143 = vsyncadd [#allocation3], 4294967040  ;;  %v26_v0 = vld [vmem:[#allocation2] sm:$0xff]  ;;  %vm31_vm0 = vcmask 261120   ;;  %v27_v1 = vld [vmem:[#allocation2 + $0x8] sm:$0xff]  ;;  %s149_s24 = smov [#allocation5]  }
  0x14   :  { %v29_v2 = vmul.f32 %v26_v0, %v26_v0  ;;  %v30_v3 = vmul.f32 %v27_v1, %v27_v1  ;;  %v85_v21 = vld [vmem:[%s203_s1] ss:$0 sm:$0xff]  ;;  %s73_s25 = sshll.u32 %s149_s24, 4  ;;  %s74_s25 = int_to_ptr.vmem [resolvable:$true] %s73_s25 }
  0x15   :  { %s120_s26 = scalar_lea.vmem %s74_s25, 256  ;;  %p125_p9 = scmp.lt.s32.totalorder %s74_s25, %s74_s25 }
  0x16   :  { %v32_v4 = vsel %vm31_vm0, %v29_v2, 0.0  ;;  %v35_v5 = vsel %vm31_vm0, %v30_v3, 0.0  ;;  %p121_p8 = scmp.ne.s32.totalorder %s74_s25, %s120_s26  ;;  %p126_p10 = scmp.lt.s32.totalorder %s120_s26, %s120_s26 }
  0x17   :  { %33 = vadd.xlane.f32.xlu0 %v32_v4 }
  0x18   :  { %p127_p11 = por %p126_p10, %p125_p9 }
  0x1a   :  { %p128_p12 = pnand %p127_p11, %p121_p8 }
  0x1b   :  { %36 = vadd.xlane.f32.xlu0 %v35_v5 }
  0xa4   :  { %v34_v6 = vpop.xlane.xlu0 %33 }
  0xa5   :  { %90 = vrsqrt.f32 %v34_v6  ;;  %vm40_vm1 = vcmp.eq.f32.partialorder %v34_v6, inf  ;;  %v43_v10 = vand.u32 2147483648, %v34_v6  ;;  %vm42_vm2 = vcmp.eq.f32.partialorder %v34_v6, 0.0 }
  0xa8   :  { %v37_v7 = vpop.xlane.xlu0 %36 }
  0xa9   :  { %92 = vrsqrt.f32 %v37_v7  ;;  %vm47_vm3 = vcmp.eq.f32.partialorder %v37_v7, inf  ;;  %v50_v16 = vand.u32 2147483648, %v37_v7  ;;  %vm49_vm4 = vcmp.eq.f32.partialorder %v37_v7, 0.0 }
  0xaf   :  { %v91_v8 = vpop.eup %90 }
  0xb0   :  { %v39_v9 = vmul.f32 %v91_v8, %v34_v6 }
  0xb2   :  { %v41_v11 = vsel %vm40_vm1, %v34_v6, %v39_v9 }
  0xb3   :  { %v93_v12 = vpop.eup %92  ;;  %v44_v13 = vsel %vm42_vm2, %v43_v10, %v41_v11 }
  0xb4   :  { %v52_v14 = vadd.f32 1e-05, %v44_v13  ;;  %v46_v15 = vmul.f32 %v93_v12, %v37_v7 }
  0xb6   :  { %94 = vrcp.f32 %v52_v14  ;;  %v48_v17 = vsel %vm47_vm3, %v37_v7, %v46_v15 }
  0xb7   :  { %v51_v18 = vsel %vm49_vm4, %v50_v16, %v48_v17 }
  0xb8   :  { %v53_v19 = vadd.f32 1e-05, %v51_v18 }
  0xba   :  { %96 = vrcp.f32 %v53_v19 }
  0xc0   :  { %v95_v20 = vpop.eup %94 }
  0xc1   :  { %v56_v22 = vmul.f32 %v95_v20, %v26_v0 }
  0xc3   :  { %v64_v23 = vmul.f32 %v85_v21, %v56_v22 }
  0xc4   :  { %v97_v24 = vpop.eup %96 }
  0xc5   :  { %v57_v25 = vmul.f32 %v97_v24, %v27_v1  ;;  %66 = vst.msk [vmem:[#allocation5] sm:$0xff] %vm31_vm0, %v64_v23 }
  0xc7   :  { %v65_v26 = vmul.f32 %v85_v21, %v57_v25 }
  0xc9   :  { %67 = vst.msk [vmem:[#allocation5 + $0x8] sm:$0xff] %vm31_vm0, %v65_v26 }
  0xca   :  { %131 = shalt.err (!%p128_p12)
}
  0xcb   :  { %s132_s28 = scalar_lea.hbm %s204_s2, 256 }
  0xcc   :  { %p133_p13 = scmp.ne.s32.totalorder %s204_s2, %s132_s28  ;;  %p136_p0 = scmp.lt.u32.totalorder %s132_s28, %s204_s2 }
  0xce   :  { %p138_p1 = pnand %p136_p0, %p133_p13 }
  0xd0   :  { %141 = shalt.err (!%p138_p1)
}
  0xd1   :  { %79 = dma.vmem_to_hbm [thread:$0]  %s74_s25, 256, %s204_s2, [#allocation4], %s147_s19, %s147_s19, %s148_s20  }
  0xd2   :  { %144 = dma.done.wait [#allocation4], 256  }
  0xd3   :  { %145 = vsyncadd [#allocation4], 4294967040 }
  0xd4   :  { %83 = vsyncpa [#allocation3], 1 }
  0xd5   :  { %84 = vsyncpa [#allocation4], 1 }

</bundles_post_ra>
